<compile_context>
chip_gen: v6e
topology: v6e:2x2x1
jax: 0.10.0
libtpu: 0.0.40
codegen_flags: <defaults>
</compile_context>

<pallas_src>
import functools

import jax
import jax.numpy as jnp
from jax.experimental import pallas as pl
from jax.experimental.pallas import tpu as pltpu

N_HEADS = 4
BN_EPS = 1e-5


def mhsa_kernel(x_ref, qkv_slab_ref, out_slab_ref, o_ref, *, B, S):
    x = x_ref[...]                                  # (B*S, C) f32
    C = x.shape[-1]
    H = C // 2
    hd = H // N_HEADS

    # Fused (outer q/k/v Linear ∘ MHA in_proj) as ONE 2-D matmul.
    # qkv_slab = [Wqkv (C,3H) ; bqkv (1,3H)], 1/sqrt(hd) folded into q columns.
    w_qkv = qkv_slab_ref[0:C, :]                    # (C, 3H)
    b_qkv = qkv_slab_ref[C:C + 1, :]                # (1, 3H)
    qkv = jnp.dot(x, w_qkv, preferred_element_type=jnp.float32) + b_qkv  # (B*S, 3H)

    # Heads onto a leading batch axis: (NH*B, S, hd).  Static lane slices of
    # one vreg-wide tile + leading-dim concat (no mixed-dim transposes).
    def split_heads(off):
        return jnp.concatenate(
            [qkv[:, off + h * hd: off + (h + 1) * hd].reshape(B, S, hd)
             for h in range(N_HEADS)], axis=0)

    q_bh = split_heads(0)                           # (NH*B, S, hd) -- pre-scaled
    k_bh = split_heads(H)
    v_bh = split_heads(2 * H)

    # Batched attention over all (head, batch) pairs at once.
    s = jnp.einsum('bqd,bkd->bqk', q_bh, k_bh,
                   preferred_element_type=jnp.float32)          # (NH*B, S, S)
    s = s - jnp.max(s, axis=-1, keepdims=True)
    p = jnp.exp(s)
    denom = jnp.sum(p, axis=-1, keepdims=True)                  # (NH*B, S, 1)
    inv = pl.reciprocal(denom, approx=True)                     # EUP slot
    inv = inv * (2.0 - denom * inv)                             # one Newton step -> f32-accurate
    o_bh = jnp.einsum('bqk,bkd->bqd', p, v_bh,
                      preferred_element_type=jnp.float32) * inv  # (NH*B, S, hd)

    # Merge heads back onto the feature (lane) dim in PyTorch order, then a
    # single K=H output projection (fused out_proj ∘ out_mlp).
    o3 = jnp.concatenate([o_bh[h * B:(h + 1) * B] for h in range(N_HEADS)],
                         axis=-1)                               # (B, S, H)
    wo = out_slab_ref[0:H, :]                                   # (H, C)
    bo = out_slab_ref[H:H + 1, :]                               # (1, C)
    y = jnp.dot(o3.reshape(B * S, H), wo,
                preferred_element_type=jnp.float32) + bo        # (B*S, C)

    # BatchNorm1d(num_features=C, affine=False), training-mode batch stats:
    # per-channel mean / biased variance over all B*S rows, eps=1e-5.
    # TODO(synk): running-mean/var buffer updates (module state) are not emitted.
    mean = jnp.mean(y, axis=0, keepdims=True)
    diff = y - mean
    var = jnp.mean(diff * diff, axis=0, keepdims=True)
    ynorm = diff * jax.lax.rsqrt(var + BN_EPS)

    # Residual add; lane-dense (B*S, C) store.
    o_ref[...] = ynorm + x


def _full_spec(shape):
    nd = len(shape)
    return pl.BlockSpec(shape, lambda i, nd=nd: (0,) * nd)


def mh_self_attention(x, fp):
    """x: (B, S, C) float32; fp: dict with packed 'qkv' and 'out' slabs."""
    B, S, C = x.shape
    x2 = x.reshape(B * S, C)
    args = (x2, fp['qkv'], fp['out'])
    kernel = functools.partial(mhsa_kernel, B=B, S=S)
    out2 = pl.pallas_call(
        kernel,
        out_shape=jax.ShapeDtypeStruct((B * S, C), x.dtype),
        grid_spec=pltpu.PrefetchScalarGridSpec(
            num_scalar_prefetch=0,
            grid=(1,),
            in_specs=[_full_spec(a.shape) for a in args],
            out_specs=_full_spec((B * S, C)),
        ),
        compiler_params=pltpu.CompilerParams(
            dimension_semantics=("arbitrary",)),
    )(*args)
    return out2.reshape(B, S, C)


def make_torch_params(key, C):
    """Deterministic synthetic parameters with PyTorch shapes."""
    H = C // 2
    ks = jax.random.split(key, 12)

    def init(k, shape, scale=0.1):
        return jax.random.normal(k, shape, jnp.float32) * scale

    return dict(
        key_w=init(ks[0], (H, C)), key_b=init(ks[1], (H,)),
        qry_w=init(ks[2], (H, C)), qry_b=init(ks[3], (H,)),
        val_w=init(ks[4], (H, C)), val_b=init(ks[5], (H,)),
        in_proj_w=init(ks[6], (3 * H, H)), in_proj_b=init(ks[7], (3 * H,)),
        out_proj_w=init(ks[8], (H, H)), out_proj_b=init(ks[9], (H,)),
        out_mlp_w=init(ks[10], (C, H)), out_mlp_b=init(ks[11], (C,)),
    )


def fuse_params(tp, C):
    """Fold back-to-back affine layers (exact) + attention scale, then pack
    everything into two slabs:
      qkv slab: (C+1, 3H) = [ Wq|Wk|Wv ; bq|bk|bv ]   (x @ W + b layout)
      out slab: (H+1, C)  = [ Wout ; bout ]
    """
    H = C // 2
    hd = H // N_HEADS
    scale = 1.0 / float(hd) ** 0.5

    wq_in = tp['in_proj_w'][:H]
    wk_in = tp['in_proj_w'][H:2 * H]
    wv_in = tp['in_proj_w'][2 * H:]
    bq_in = tp['in_proj_b'][:H]
    bk_in = tp['in_proj_b'][H:2 * H]
    bv_in = tp['in_proj_b'][2 * H:]

    wq_f = (tp['qry_w'].T @ wq_in.T) * scale                  # (C, H), scale folded
    bq_f = (tp['qry_b'] @ wq_in.T + bq_in) * scale
    wk_f = tp['key_w'].T @ wk_in.T
    bk_f = tp['key_b'] @ wk_in.T + bk_in
    wv_f = tp['val_w'].T @ wv_in.T
    bv_f = tp['val_b'] @ wv_in.T + bv_in

    w_qkv = jnp.concatenate([wq_f, wk_f, wv_f], axis=1)       # (C, 3H)
    b_qkv = jnp.concatenate([bq_f, bk_f, bv_f], axis=0)       # (3H,)
    qkv_slab = jnp.concatenate([w_qkv, b_qkv[None, :]], axis=0)   # (C+1, 3H)

    wo_f = tp['out_proj_w'].T @ tp['out_mlp_w'].T             # (H, C)
    bo_f = tp['out_proj_b'] @ tp['out_mlp_w'].T + tp['out_mlp_b']
    out_slab = jnp.concatenate([wo_f, bo_f[None, :]], axis=0)     # (H+1, C)

    return dict(qkv=qkv_slab, out=out_slab)


def reference(x, tp):
    """Pure-JAX reference mirroring the (unfused) PyTorch forward."""
    B, S, C = x.shape
    H = C // 2
    hd = H // N_HEADS

    k = x @ tp['key_w'].T + tp['key_b']
    q = x @ tp['qry_w'].T + tp['qry_b']
    v = x @ tp['val_w'].T + tp['val_b']

    qp = q @ tp['in_proj_w'][:H].T + tp['in_proj_b'][:H]
    kp_ = k @ tp['in_proj_w'][H:2 * H].T + tp['in_proj_b'][H:2 * H]
    vp = v @ tp['in_proj_w'][2 * H:].T + tp['in_proj_b'][2 * H:]

    qh = qp.reshape(B, S, N_HEADS, hd).transpose(0, 2, 1, 3)
    kh = kp_.reshape(B, S, N_HEADS, hd).transpose(0, 2, 1, 3)
    vh = vp.reshape(B, S, N_HEADS, hd).transpose(0, 2, 1, 3)

    s = jnp.einsum('bhqd,bhkd->bhqk', qh, kh) / (hd ** 0.5)
    p = jax.nn.softmax(s, axis=-1)
    o = jnp.einsum('bhqk,bhkd->bhqd', p, vh)
    o = o.transpose(0, 2, 1, 3).reshape(B, S, H)

    o = o @ tp['out_proj_w'].T + tp['out_proj_b']
    y = o @ tp['out_mlp_w'].T + tp['out_mlp_b']

    mean = jnp.mean(y, axis=(0, 1), keepdims=True)
    var = jnp.mean((y - mean) ** 2, axis=(0, 1), keepdims=True)
    return (y - mean) / jnp.sqrt(var + BN_EPS) + x


if __name__ == "__main__":
    B, S, C = 2, 16, 32   # channel=32 -> hidden=16, 4 heads, head_dim=4
    key = jax.random.PRNGKey(0)
    kx, kparams = jax.random.split(key)
    x = jax.random.normal(kx, (B, S, C), jnp.float32)

    tp = make_torch_params(kparams, C)   # PyTorch-shaped params (reference)
    fp = fuse_params(tp, C)              # fused + packed kernel-layout params

    out = jax.block_until_ready(mh_self_attention(x, fp))
    ref = reference(x, tp)

    assert out.shape == (B, S, C)
    err = float(jnp.max(jnp.abs(out - ref)))
    assert err < 2e-4, err
    print("KERNEL_OK")
</pallas_src>

<mosaic_0001>
module attributes {stable_mosaic.version = 11 : i64} {
  func.func @mhsa_kernel(%arg0: i32, %arg1: memref<32x32xf32, #tpu.memory_space<vmem>>, %arg2: memref<33x48xf32, #tpu.memory_space<vmem>>, %arg3: memref<17x32xf32, #tpu.memory_space<vmem>>, %arg4: memref<32x32xf32, #tpu.memory_space<vmem>>) attributes {dimension_semantics = [#tpu.dimension_semantics<arbitrary>], iteration_bounds = array<i64: 1>, scalar_prefetch = 0 : i64, scratch_operands = 0 : i64, tpu.core_type = #tpu.core_type<tc>, window_params = [{pipeline_mode = #tpu.pipeline_mode<synchronous>, transform_indices = @transform_0, window_bounds = array<i64: 32, 32>}, {pipeline_mode = #tpu.pipeline_mode<synchronous>, transform_indices = @transform_1, window_bounds = array<i64: 33, 48>}, {pipeline_mode = #tpu.pipeline_mode<synchronous>, transform_indices = @transform_2, window_bounds = array<i64: 17, 32>}, {pipeline_mode = #tpu.pipeline_mode<synchronous>, transform_indices = @transform_3, window_bounds = array<i64: 32, 32>}]} {
    %c0 = arith.constant 0 : index
    %c0_0 = arith.constant 0 : index
    %0 = vector.load %arg1[%c0, %c0_0] : memref<32x32xf32, #tpu.memory_space<vmem>>, vector<32x32xf32>
    %c0_1 = arith.constant 0 : index
    %c0_2 = arith.constant 0 : index
    %1 = vector.load %arg2[%c0_1, %c0_2] : memref<33x48xf32, #tpu.memory_space<vmem>>, vector<32x48xf32>
    %c32 = arith.constant 32 : index
    %c0_3 = arith.constant 0 : index
    %2 = vector.load %arg2[%c32, %c0_3] : memref<33x48xf32, #tpu.memory_space<vmem>>, vector<1x48xf32>
    %cst = arith.constant dense<0.000000e+00> : vector<32x48xf32>
    %3 = tpu.matmul %0, %1, %cst {dimension_numbers = #tpu.dot_dimension_numbers<[1], [0], [0], [1], [0, 0, 1, 1], [], []>} : vector<32x32xf32>, vector<32x48xf32>, vector<32x48xf32> -> vector<32x48xf32>
    %4 = vector.broadcast %2 : vector<1x48xf32> to vector<32x48xf32>
    %5 = arith.addf %3, %4 : vector<32x48xf32>
    %6 = vector.extract_strided_slice %5 {offsets = [0, 0], sizes = [32, 4], strides = [1, 1]} : vector<32x48xf32> to vector<32x4xf32>
    %7 = vector.shape_cast %6 : vector<32x4xf32> to vector<2x16x4xf32>
    %8 = vector.extract_strided_slice %5 {offsets = [0, 4], sizes = [32, 4], strides = [1, 1]} : vector<32x48xf32> to vector<32x4xf32>
    %9 = vector.shape_cast %8 : vector<32x4xf32> to vector<2x16x4xf32>
    %10 = vector.extract_strided_slice %5 {offsets = [0, 8], sizes = [32, 4], strides = [1, 1]} : vector<32x48xf32> to vector<32x4xf32>
    %11 = vector.shape_cast %10 : vector<32x4xf32> to vector<2x16x4xf32>
    %12 = vector.extract_strided_slice %5 {offsets = [0, 12], sizes = [32, 4], strides = [1, 1]} : vector<32x48xf32> to vector<32x4xf32>
    %13 = vector.shape_cast %12 : vector<32x4xf32> to vector<2x16x4xf32>
    %14 = tpu.concatenate %7, %9, %11, %13 in 0 : vector<2x16x4xf32>, vector<2x16x4xf32>, vector<2x16x4xf32>, vector<2x16x4xf32> -> vector<8x16x4xf32>
    %15 = vector.extract_strided_slice %5 {offsets = [0, 16], sizes = [32, 4], strides = [1, 1]} : vector<32x48xf32> to vector<32x4xf32>
    %16 = vector.shape_cast %15 : vector<32x4xf32> to vector<2x16x4xf32>
    %17 = vector.extract_strided_slice %5 {offsets = [0, 20], sizes = [32, 4], strides = [1, 1]} : vector<32x48xf32> to vector<32x4xf32>
    %18 = vector.shape_cast %17 : vector<32x4xf32> to vector<2x16x4xf32>
    %19 = vector.extract_strided_slice %5 {offsets = [0, 24], sizes = [32, 4], strides = [1, 1]} : vector<32x48xf32> to vector<32x4xf32>
    %20 = vector.shape_cast %19 : vector<32x4xf32> to vector<2x16x4xf32>
    %21 = vector.extract_strided_slice %5 {offsets = [0, 28], sizes = [32, 4], strides = [1, 1]} : vector<32x48xf32> to vector<32x4xf32>
    %22 = vector.shape_cast %21 : vector<32x4xf32> to vector<2x16x4xf32>
    %23 = tpu.concatenate %16, %18, %20, %22 in 0 : vector<2x16x4xf32>, vector<2x16x4xf32>, vector<2x16x4xf32>, vector<2x16x4xf32> -> vector<8x16x4xf32>
    %24 = vector.extract_strided_slice %5 {offsets = [0, 32], sizes = [32, 4], strides = [1, 1]} : vector<32x48xf32> to vector<32x4xf32>
    %25 = vector.shape_cast %24 : vector<32x4xf32> to vector<2x16x4xf32>
    %26 = vector.extract_strided_slice %5 {offsets = [0, 36], sizes = [32, 4], strides = [1, 1]} : vector<32x48xf32> to vector<32x4xf32>
    %27 = vector.shape_cast %26 : vector<32x4xf32> to vector<2x16x4xf32>
    %28 = vector.extract_strided_slice %5 {offsets = [0, 40], sizes = [32, 4], strides = [1, 1]} : vector<32x48xf32> to vector<32x4xf32>
    %29 = vector.shape_cast %28 : vector<32x4xf32> to vector<2x16x4xf32>
    %30 = vector.extract_strided_slice %5 {offsets = [0, 44], sizes = [32, 4], strides = [1, 1]} : vector<32x48xf32> to vector<32x4xf32>
    %31 = vector.shape_cast %30 : vector<32x4xf32> to vector<2x16x4xf32>
    %32 = tpu.concatenate %25, %27, %29, %31 in 0 : vector<2x16x4xf32>, vector<2x16x4xf32>, vector<2x16x4xf32>, vector<2x16x4xf32> -> vector<8x16x4xf32>
    "tpu.trace_start"() <{level = 10 : i32, message = "bqd,bkd->bqk"}> : () -> ()
    %cst_4 = arith.constant dense<0.000000e+00> : vector<8x16x16xf32>
    %33 = tpu.matmul %14, %23, %cst_4 {dimension_numbers = #tpu.dot_dimension_numbers<[2], [2], [1], [1], [0, 0, 0, 1, 1, 1], [0], [0]>} : vector<8x16x4xf32>, vector<8x16x4xf32>, vector<8x16x16xf32> -> vector<8x16x16xf32>
    "tpu.trace_stop"() : () -> ()
    %cst_5 = arith.constant dense<0xFF800000> : vector<8x16xf32>
    %34 = vector.multi_reduction <maximumf>, %33, %cst_5 [2] : vector<8x16x16xf32> to vector<8x16xf32>
    %35 = vector.shape_cast %34 : vector<8x16xf32> to vector<8x16x1xf32>
    %36 = vector.broadcast %35 : vector<8x16x1xf32> to vector<8x16x16xf32>
    %37 = arith.subf %33, %36 : vector<8x16x16xf32>
    %38 = math.exp %37 : vector<8x16x16xf32>
    %cst_6 = arith.constant dense<0.000000e+00> : vector<8x16xf32>
    %39 = vector.multi_reduction <add>, %38, %cst_6 [2] : vector<8x16x16xf32> to vector<8x16xf32>
    %40 = vector.shape_cast %39 : vector<8x16xf32> to vector<8x16x1xf32>
    %41 = tpu.reciprocal %40 {approx = true} : vector<8x16x1xf32> -> vector<8x16x1xf32>
    %42 = arith.mulf %40, %41 : vector<8x16x1xf32>
    %cst_7 = arith.constant 2.000000e+00 : f32
    %43 = vector.broadcast %cst_7 : f32 to vector<8x16x1xf32>
    %44 = arith.subf %43, %42 : vector<8x16x1xf32>
    %45 = arith.mulf %41, %44 : vector<8x16x1xf32>
    "tpu.trace_start"() <{level = 10 : i32, message = "bqk,bkd->bqd"}> : () -> ()
    %cst_8 = arith.constant dense<0.000000e+00> : vector<8x16x4xf32>
    %46 = tpu.matmul %38, %32, %cst_8 {dimension_numbers = #tpu.dot_dimension_numbers<[2], [1], [1], [2], [0, 0, 0, 1, 1, 2], [0], [0]>} : vector<8x16x16xf32>, vector<8x16x4xf32>, vector<8x16x4xf32> -> vector<8x16x4xf32>
    "tpu.trace_stop"() : () -> ()
    %47 = vector.broadcast %45 : vector<8x16x1xf32> to vector<8x16x4xf32>
    %48 = arith.mulf %46, %47 : vector<8x16x4xf32>
    %49 = vector.extract_strided_slice %48 {offsets = [0, 0, 0], sizes = [2, 16, 4], strides = [1, 1, 1]} : vector<8x16x4xf32> to vector<2x16x4xf32>
    %50 = vector.extract_strided_slice %48 {offsets = [2, 0, 0], sizes = [2, 16, 4], strides = [1, 1, 1]} : vector<8x16x4xf32> to vector<2x16x4xf32>
    %51 = vector.extract_strided_slice %48 {offsets = [4, 0, 0], sizes = [2, 16, 4], strides = [1, 1, 1]} : vector<8x16x4xf32> to vector<2x16x4xf32>
    %52 = vector.extract_strided_slice %48 {offsets = [6, 0, 0], sizes = [2, 16, 4], strides = [1, 1, 1]} : vector<8x16x4xf32> to vector<2x16x4xf32>
    %53 = tpu.concatenate %49, %50, %51, %52 in 2 : vector<2x16x4xf32>, vector<2x16x4xf32>, vector<2x16x4xf32>, vector<2x16x4xf32> -> vector<2x16x16xf32>
    %c0_9 = arith.constant 0 : index
    %c0_10 = arith.constant 0 : index
    %54 = vector.load %arg3[%c0_9, %c0_10] : memref<17x32xf32, #tpu.memory_space<vmem>>, vector<16x32xf32>
    %c16 = arith.constant 16 : index
    %c0_11 = arith.constant 0 : index
    %55 = vector.load %arg3[%c16, %c0_11] : memref<17x32xf32, #tpu.memory_space<vmem>>, vector<1x32xf32>
    %56 = vector.shape_cast %53 : vector<2x16x16xf32> to vector<32x16xf32>
    %cst_12 = arith.constant dense<0.000000e+00> : vector<32x32xf32>
    %57 = tpu.matmul %56, %54, %cst_12 {dimension_numbers = #tpu.dot_dimension_numbers<[1], [0], [0], [1], [0, 0, 1, 1], [], []>} : vector<32x16xf32>, vector<16x32xf32>, vector<32x32xf32> -> vector<32x32xf32>
    %58 = vector.broadcast %55 : vector<1x32xf32> to vector<32x32xf32>
    %59 = arith.addf %57, %58 : vector<32x32xf32>
    %cst_13 = arith.constant dense<0.000000e+00> : vector<32xf32>
    %60 = vector.multi_reduction <add>, %59, %cst_13 [0] : vector<32x32xf32> to vector<32xf32>
    %61 = vector.shape_cast %60 : vector<32xf32> to vector<1x32xf32>
    %cst_14 = arith.constant 3.200000e+01 : f32
    %62 = vector.broadcast %cst_14 : f32 to vector<1x32xf32>
    %63 = arith.divf %61, %62 : vector<1x32xf32>
    %64 = vector.broadcast %63 : vector<1x32xf32> to vector<32x32xf32>
    %65 = arith.subf %59, %64 : vector<32x32xf32>
    %66 = arith.mulf %65, %65 : vector<32x32xf32>
    %cst_15 = arith.constant dense<0.000000e+00> : vector<32xf32>
    %67 = vector.multi_reduction <add>, %66, %cst_15 [0] : vector<32x32xf32> to vector<32xf32>
    %68 = vector.shape_cast %67 : vector<32xf32> to vector<1x32xf32>
    %cst_16 = arith.constant 3.200000e+01 : f32
    %69 = vector.broadcast %cst_16 : f32 to vector<1x32xf32>
    %70 = arith.divf %68, %69 : vector<1x32xf32>
    %cst_17 = arith.constant 9.99999974E-6 : f32
    %71 = vector.broadcast %cst_17 : f32 to vector<1x32xf32>
    %72 = arith.addf %70, %71 : vector<1x32xf32>
    %73 = math.rsqrt %72 : vector<1x32xf32>
    %74 = vector.broadcast %73 : vector<1x32xf32> to vector<32x32xf32>
    %75 = arith.mulf %65, %74 : vector<32x32xf32>
    %76 = arith.addf %75, %0 : vector<32x32xf32>
    %c0_18 = arith.constant 0 : index
    %c0_19 = arith.constant 0 : index
    %77 = vector.load %arg4[%c0_18, %c0_19] : memref<32x32xf32, #tpu.memory_space<vmem>>, vector<32x32xf32>
    tpu.vector_store %arg4[%c0_18, %c0_19], %76 {strides = array<i32>} : memref<32x32xf32, #tpu.memory_space<vmem>>, vector<32x32xf32>,
    return
  }
  func.func @transform_0(%arg0: i32) -> (i32, i32) {
    %c0_i32 = arith.constant 0 : i32
    %c0_i32_0 = arith.constant 0 : i32
    %c0_i32_1 = arith.constant 0 : i32
    return %c0_i32, %c0_i32_0 : i32, i32
  }
  func.func @transform_1(%arg0: i32) -> (i32, i32) {
    %c0_i32 = arith.constant 0 : i32
    %c0_i32_0 = arith.constant 0 : i32
    %c0_i32_1 = arith.constant 0 : i32
    return %c0_i32, %c0_i32_0 : i32, i32
  }
  func.func @transform_2(%arg0: i32) -> (i32, i32) {
    %c0_i32 = arith.constant 0 : i32
    %c0_i32_0 = arith.constant 0 : i32
    %c0_i32_1 = arith.constant 0 : i32
    return %c0_i32, %c0_i32_0 : i32, i32
  }
  func.func @transform_3(%arg0: i32) -> (i32, i32) {
    %c0_i32 = arith.constant 0 : i32
    %c0_i32_0 = arith.constant 0 : i32
    %c0_i32_1 = arith.constant 0 : i32
    return %c0_i32, %c0_i32_0 : i32, i32
  }
}

</mosaic_0001>

<bundles_post_ra>
// kernel: tpu_custom_call.1
= control target key start
LH: loop header
LB: loop body
LE: loop exit
PB: predicated region body
PF: predicated region fallthrough
CT: control target
= control target key end

     0   :  { %8 = vsyncpa [#allocation3], 0  ;;  %s2879_s0 = inlined_call_operand.hbm [shape: f32[32,32], index: 0, kind: input, shape index: {}]   ;;  %s2880_s1 = inlined_call_operand.hbm [shape: f32[33,48], index: 1, kind: input, shape index: {}]   ;;  %s2881_s2 = inlined_call_operand.hbm [shape: f32[17,32], index: 2, kind: input, shape index: {}]   ;;  %s2882_s3 = inlined_call_operand.hbm [shape: f32[32,32], index: 3, kind: output, shape index: {}]  }
   0x1   :  { %9 = vsyncpa [#allocation6], 0 }
   0x2   :  { %10 = vsyncpa [#allocation4], 0  ;;  %s2489_s12 = smov [#allocation5]   ;;  %s2490_s14 = smov [#allocation2]  }
   0x3   :  { %s28_s13 = sshll.u32 %s2489_s12, 4  ;;  %s16_s15 = sshll.u32 %s2490_s14, 4  ;;  %s29_s13 = int_to_ptr.vmem [resolvable:$true] %s28_s13  ;;  %s17_s15 = int_to_ptr.vmem [resolvable:$true] %s16_s15 }
   0x4   :  { %s2411_s16 = scalar_lea.vmem %s29_s13, 640  ;;  %p2416_p1 = scmp.lt.s32.totalorder %s29_s13, %s29_s13 }
   0x5   :  { %p2412_p0 = scmp.ne.s32.totalorder %s29_s13, %s2411_s16  ;;  %p2417_p2 = scmp.lt.s32.totalorder %s2411_s16, %s2411_s16 }
   0x7   :  { %p2418_p3 = por %p2417_p2, %p2416_p1 }
   0x9   :  { %p2419_p4 = pnand %p2418_p3, %p2412_p0 }
   0xb   :  { %2422 = shalt.err (!%p2419_p4)
}
   0xc   :  { %s2491_s17 = smov 128   ;;  %s2492_s18 = smov 8  }
   0xd   :  { %34 = dma.hbm_to_vmem [thread:$0]  %s2880_s1, 640, %s29_s13, [#allocation6], %s2491_s17, %s2491_s17, %s2492_s18  }
   0xe   :  { %s2431_s21 = scalar_lea.vmem %s17_s15, 512  ;;  %p2436_p6 = scmp.lt.s32.totalorder %s17_s15, %s17_s15 }
   0xf   :  { %p2432_p5 = scmp.ne.s32.totalorder %s17_s15, %s2431_s21  ;;  %p2437_p7 = scmp.lt.s32.totalorder %s2431_s21, %s2431_s21 }
  0x11   :  { %p2438_p8 = por %p2437_p7, %p2436_p6 }
  0x13   :  { %p2439_p9 = pnand %p2438_p8, %p2432_p5 }
  0x15   :  { %2442 = shalt.err (!%p2439_p9)
}
  0x16   :  { %22 = dma.hbm_to_vmem [thread:$0]  %s2879_s0, 512, %s17_s15, [#allocation3], %s2491_s17, %s2491_s17, %s2492_s18  }
  0x17   :  { %s2493_s24 = smov [#allocation7]  }
  0x18   :  { %s40_s25 = sshll.u32 %s2493_s24, 4  ;;  %s41_s25 = int_to_ptr.vmem [resolvable:$true] %s40_s25 }
  0x19   :  { %s2451_s26 = scalar_lea.vmem %s41_s25, 384  ;;  %p2456_p11 = scmp.lt.s32.totalorder %s41_s25, %s41_s25 }
  0x1a   :  { %p2452_p10 = scmp.ne.s32.totalorder %s41_s25, %s2451_s26  ;;  %p2457_p12 = scmp.lt.s32.totalorder %s2451_s26, %s2451_s26 }
  0x1c   :  { %p2458_p13 = por %p2457_p12, %p2456_p11 }
  0x1e   :  { %p2459_p0 = pnand %p2458_p13, %p2452_p10 }
  0x20   :  { %2462 = shalt.err (!%p2459_p0)
}
  0x21   :  { %46 = dma.hbm_to_vmem [thread:$0]  %s2881_s2, 384, %s41_s25, [#allocation6], %s2491_s17, %s2491_s17, %s2492_s18  }
  0x22   :  { %2483 = dma.done.wait [#allocation3], 512  }
  0x23   :  { %2484 = vsyncadd [#allocation3], 4294966784 }
  0x24   :  { %2485 = dma.done.wait [#allocation6], 1024  }
  0x25   :  { %2486 = vsyncadd [#allocation6], 4294966272  ;;  %vm69_vm0 = vcmask 261120   ;;  %v63_v0 = vld [vmem:[#allocation5 + $0x18] sm:$0xff]  ;;  %v62_v1 = vld [vmem:[#allocation5 + $0x10] sm:$0xff]  ;;  %vm199_vm1 = vcmask 31744  }
  0x26   :  { %2184 = vmatprep.subr.mxu0 %v63_v0  ;;  %v56_v2 = vld [vmem:[#allocation2] sm:$0xff]  ;;  %v61_v3 = vld [vmem:[#allocation5 + $0x8] sm:$0xff]  ;;  %v58_v6 = vld [vmem:[#allocation2 + $0x10] sm:$0xff]  ;;  %s2494_s0 = smov 124   ;;  %s2495_s2 = smov 120   ;;  %vm892_vm2 = vcmask 130048  }
  0x27   :  { %2185 = vmatpush3.msra.mxu0 %v63_v0  ;;  %2192 = vmatprep.mubr.msk.f32.mxu0 %vm69_vm0, %v56_v2  ;;  %v60_v4 = vld [vmem:[#allocation5] sm:$0xff]  ;;  %v57_v5 = vld [vmem:[#allocation2 + $0x8] sm:$0xff]  ;;  %v59_v7 = vld [vmem:[#allocation2 + $0x18] sm:$0xff]  ;;  %s2496_s28 = smov 116   ;;  %s2497_s29 = smov 112   ;;  %vm1870_vm3 = vcmask 97280  }
  0x28   :  { %2186 = vmatprep.subr.mxu0 %v62_v1  ;;  %v2048_v8 = vld [vmem:[#allocation5 + $0x20] ss:$0 sm:$0xff]  ;;  %s2498_s30 = smov 96   ;;  %s2499_s4 = smov 4   ;;  %vm1865_vm4 = vcmask 64512  }
  0x29   :  { %2187 = vmatpush3.msra.mxu0 %v62_v1  ;;  %s2500_s5 = smov 12   ;;  %s2501_s6 = smov [#allocation8]  }
  0x2a   :  { %2188 = vmatprep.subr.mxu0 %v61_v3  ;;  %s2035_s7 = sshll.u32 %s2501_s6, 4  ;;  %s2036_s7 = int_to_ptr.vmem [resolvable:$true] %s2035_s7 }
  0x2b   :  { %2189 = vmatpush3.msra.mxu0 %v61_v3  ;;  %s2463_s8 = scalar_lea.vmem %s2036_s7, 512  ;;  %p2468_p2 = scmp.lt.s32.totalorder %s2036_s7, %s2036_s7 }
  0x2c   :  { %2190 = vmatprep.subr.mxu0 %v60_v4  ;;  %p2464_p1 = scmp.ne.s32.totalorder %s2036_s7, %s2463_s8  ;;  %p2469_p3 = scmp.lt.s32.totalorder %s2463_s8, %s2463_s8 }
  0x2d   :  { %2191 = vmatpush3.msra.mxu0 %v60_v4 }
  0x2e   :  { %2193 = vmatmul.mubr.msk.f32.vlgmr.msra.gmra.mxu0 %vm69_vm0, %v57_v5  ;;  %p2470_p4 = por %p2469_p3, %p2468_p2 }
  0x2f   :  { %2195 = vmatprep.mubr.msk.f32.mxu0 %vm69_vm0, %v58_v6 }
  0x30   :  { %p2471_p5 = pnand %p2470_p4, %p2464_p1 }
  0x32   :  { %2196 = vmatmul.mubr.msk.f32.gmra.mxu0 %vm69_vm0, %v59_v7 }
  0xee   :  { %v2194_v9 = vpop.f32.mrf.mxu0 }
  0xef   :  { %v2544_v10 = vadd.f32 %v2194_v9, %v2048_v8 }
  0xf0   :  { %v148_v11 = vpop.f32.mrf.mxu0 }
  0xf1   :  { %v149_v12 = vadd.f32 %v2048_v8, %v148_v11  ;;  %173 = vrot.lane.b32.xlu0 %v2544_v10, %s2494_s0 }
  0xf2   :  { %v2197_v13 = vpop.f32.mrf.mxu0 }
  0xf3   :  { %v2547_v14 = vadd.f32 %v2197_v13, %v2048_v8  ;;  %2202 = vmatprep.mubr.msk.f32.mxu1 %vm199_vm1, %v149_v12 }
  0xf4   :  { %v158_v15 = vpop.f32.mrf.mxu0 }
  0xf5   :  { %v2550_v16 = vadd.f32 %v2048_v8, %v158_v15  ;;  %177 = vrot.lane.b32.xlu1 %v2547_v14, %s2494_s0  ;;  %171 = vrot.lane.b32.xlu0 %v149_v12, %s2494_s0 }
  0xf7   :  { %2209 = vmatprep.mubr.msk.f32.mxu0 %vm199_vm1, %v2550_v16 }
  0xf9   :  { %175 = vrot.lane.b32.xlu1 %v2550_v16, %s2494_s0  ;;  %181 = vrot.lane.b32.xlu0 %v2544_v10, %s2495_s2 }
  0xfd   :  { %179 = vrot.lane.b32.xlu1 %v149_v12, %s2495_s2  ;;  %185 = vrot.lane.b32.xlu0 %v2547_v14, %s2495_s2 }
 0x101   :  { %183 = vrot.lane.b32.xlu1 %v2550_v16, %s2495_s2  ;;  %189 = vrot.lane.b32.xlu0 %v2544_v10, %s2496_s28 }
 0x105   :  { %187 = vrot.lane.b32.xlu1 %v149_v12, %s2496_s28  ;;  %193 = vrot.lane.b32.xlu0 %v2547_v14, %s2496_s28 }
 0x109   :  { %191 = vrot.lane.b32.xlu1 %v2550_v16, %s2496_s28  ;;  %197 = vrot.lane.b32.xlu0 %v2544_v10, %s2497_s29 }
 0x10d   :  { %195 = vrot.lane.b32.xlu1 %v149_v12, %s2497_s29  ;;  %285 = vrot.lane.b32.xlu0 %v2547_v14, %s2497_s29 }
 0x111   :  { %283 = vrot.lane.b32.xlu1 %v2550_v16, %s2497_s29 }
 0x163   :  { %v2565_v17 = vpop.permute.xlu0 %173 }
 0x164   :  { %372 = vrot.lane.b32.xlu0 %v2565_v17, %s2497_s29 }
 0x167   :  { %v2568_v18 = vpop.permute.xlu1 %177  ;;  %v172_v19 = vpop.permute.xlu0 %171 }
 0x168   :  { %459 = vrot.lane.b32.xlu0 %v2568_v18, %s2497_s29  ;;  %370 = vrot.lane.b32.xlu1 %v172_v19, %s2497_s29 }
 0x16b   :  { %v176_v20 = vpop.permute.xlu1 %175  ;;  %v2571_v21 = vpop.permute.xlu0 %181 }
 0x16c   :  { %457 = vrot.lane.b32.xlu1 %v176_v20, %s2497_s29  ;;  %546 = vrot.lane.b32.xlu0 %v2571_v21, %s2497_s29 }
 0x16f   :  { %v180_v22 = vpop.permute.xlu1 %179  ;;  %v2574_v23 = vpop.permute.xlu0 %185 }
 0x170   :  { %544 = vrot.lane.b32.xlu1 %v180_v22, %s2497_s29  ;;  %633 = vrot.lane.b32.xlu0 %v2574_v23, %s2497_s29 }
 0x173   :  { %v2577_v24 = vpop.permute.xlu1 %183  ;;  %v2579_v25 = vpop.permute.xlu0 %189 }
 0x174   :  { %631 = vrot.lane.b32.xlu1 %v2577_v24, %s2497_s29  ;;  %720 = vrot.lane.b32.xlu0 %v2579_v25, %s2497_s29 }
 0x177   :  { %v2583_v26 = vpop.permute.xlu1 %187  ;;  %v2585_v27 = vpop.permute.xlu0 %193 }
 0x178   :  { %718 = vrot.lane.b32.xlu1 %v2583_v26, %s2497_s29  ;;  %807 = vrot.lane.b32.xlu0 %v2585_v27, %s2497_s29 }
 0x17b   :  { %v2589_v28 = vpop.permute.xlu1 %191  ;;  %v198_v29 = vpop.permute.xlu0 %197 }
 0x17c   :  { %805 = vrot.lane.b32.xlu1 %v2589_v28, %s2497_s29  ;;  %1101 = vrot.lane.b32.xlu0 %v149_v12, %s2498_s30 }
 0x17d   :  { %2198 = vmatprep.subr.msk.mxu1 %vm199_vm1, %v198_v29 }
 0x17e   :  { %2199 = vmatpush3.xpose.msk.msra.mxu1 %vm199_vm1, %v198_v29 }
 0x17f   :  { %v196_v30 = vpop.permute.xlu1 %195  ;;  %v286_v31 = vpop.permute.xlu0 %285 }
 0x180   :  { %1103 = vrot.lane.b32.xlu1 %v2544_v10, %s2498_s30  ;;  %1277 = vrot.lane.b32.xlu0 %v2565_v17, %s2498_s30 }
 0x181   :  { %2200 = vmatprep.subr.msk.mxu1 %vm199_vm1, %v196_v30  ;;  %2205 = vmatprep.subr.msk.mxu0 %vm199_vm1, %v286_v31 }
 0x182   :  { %2201 = vmatpush3.xpose.msk.msra.mxu1 %vm199_vm1, %v196_v30  ;;  %2206 = vmatpush3.xpose.msk.msra.mxu0 %vm199_vm1, %v286_v31 }
 0x183   :  { %v284_v32 = vpop.permute.xlu1 %283 }
 0x184   :  { %1190 = vrot.lane.b32.xlu1 %v2547_v14, %s2498_s30  ;;  %1364 = vrot.lane.b32.xlu0 %v2568_v18, %s2498_s30 }
 0x185   :  { %2203 = vmatmul.mubr.msk.f32.vlgmr.msra.gmra.mxu1 %vm199_vm1, %v2544_v10  ;;  %2207 = vmatprep.subr.msk.mxu0 %vm199_vm1, %v284_v32 }
 0x186   :  { %2208 = vmatpush3.xpose.msk.msra.mxu0 %vm199_vm1, %v284_v32  ;;  %2216 = vmatprep.mubr.msk.f32.mxu1 %vm199_vm1, %v172_v19 }
 0x188   :  { %1188 = vrot.lane.b32.xlu1 %v2550_v16, %s2498_s30  ;;  %1538 = vrot.lane.b32.xlu0 %v2574_v23, %s2498_s30 }
 0x189   :  { %2210 = vmatmul.mubr.msk.f32.vlgmr.msra.gmra.mxu0 %vm199_vm1, %v2547_v14 }
 0x18a   :  { %2223 = vmatprep.mubr.msk.f32.mxu0 %vm199_vm1, %v176_v20 }
 0x18c   :  { %1275 = vrot.lane.b32.xlu1 %v172_v19, %s2498_s30  ;;  %1362 = vrot.lane.b32.xlu0 %v176_v20, %s2498_s30 }
 0x190   :  { %1451 = vrot.lane.b32.xlu1 %v2571_v21, %s2498_s30  ;;  %1536 = vrot.lane.b32.xlu0 %v2577_v24, %s2498_s30 }
 0x194   :  { %1449 = vrot.lane.b32.xlu1 %v180_v22, %s2498_s30 }
 0x198   :  { %1625 = vrot.lane.b32.xlu1 %v2579_v25, %s2498_s30 }
 0x19c   :  { %1623 = vrot.lane.b32.xlu1 %v2583_v26, %s2498_s30 }
 0x1d6   :  { %v373_v33 = vpop.permute.xlu0 %372 }
 0x1d7   :  { %2212 = vmatprep.subr.msk.mxu1 %vm199_vm1, %v373_v33 }
 0x1d8   :  { %2213 = vmatpush3.xpose.msk.msra.mxu1 %vm199_vm1, %v373_v33 }
 0x1da   :  { %v371_v34 = vpop.permute.xlu1 %370  ;;  %v460_v35 = vpop.permute.xlu0 %459 }
 0x1db   :  { %2214 = vmatprep.subr.msk.mxu1 %vm199_vm1, %v371_v34  ;;  %2219 = vmatprep.subr.msk.mxu0 %vm199_vm1, %v460_v35 }
 0x1dc   :  { %2215 = vmatpush3.xpose.msk.msra.mxu1 %vm199_vm1, %v371_v34  ;;  %2220 = vmatpush3.xpose.msk.msra.mxu0 %vm199_vm1, %v460_v35 }
 0x1de   :  { %v458_v36 = vpop.permute.xlu1 %457  ;;  %v547_v37 = vpop.permute.xlu0 %546 }
 0x1df   :  { %2217 = vmatmul.mubr.msk.f32.vlgmr.msra.gmra.mxu1 %vm199_vm1, %v2565_v17  ;;  %2221 = vmatprep.subr.msk.mxu0 %vm199_vm1, %v458_v36 }
 0x1e0   :  { %2226 = vmatprep.subr.msk.mxu1 %vm199_vm1, %v547_v37  ;;  %2222 = vmatpush3.xpose.msk.msra.mxu0 %vm199_vm1, %v458_v36 }
 0x1e1   :  { %2227 = vmatpush3.xpose.msk.msra.mxu1 %vm199_vm1, %v547_v37  ;;  %2230 = vmatprep.mubr.msk.f32.mxu1 %vm199_vm1, %v180_v22 }
 0x1e2   :  { %v545_v38 = vpop.permute.xlu1 %544  ;;  %v634_v39 = vpop.permute.xlu0 %633 }
 0x1e3   :  { %2224 = vmatmul.mubr.msk.f32.vlgmr.msra.gmra.mxu0 %vm199_vm1, %v2568_v18  ;;  %2228 = vmatprep.subr.msk.mxu1 %vm199_vm1, %v545_v38 }
 0x1e4   :  { %2233 = vmatprep.subr.msk.mxu0 %vm199_vm1, %v634_v39  ;;  %2237 = vmatprep.mubr.msk.f32.mxu0 %vm199_vm1, %v2577_v24 }
 0x1e5   :  { %2229 = vmatpush3.xpose.msk.msra.mxu1 %vm199_vm1, %v545_v38  ;;  %2234 = vmatpush3.xpose.msk.msra.mxu0 %vm199_vm1, %v634_v39 }
 0x1e6   :  { %v632_v40 = vpop.permute.xlu1 %631  ;;  %v721_v41 = vpop.permute.xlu0 %720 }
 0x1e7   :  { %2235 = vmatprep.subr.msk.mxu0 %vm199_vm1, %v632_v40  ;;  %2240 = vmatprep.subr.msk.mxu1 %vm199_vm1, %v721_v41 }
 0x1e8   :  { %2231 = vmatmul.mubr.msk.f32.vlgmr.msra.gmra.mxu1 %vm199_vm1, %v2571_v21 }
 0x1e9   :  { %2236 = vmatpush3.xpose.msk.msra.mxu0 %vm199_vm1, %v632_v40  ;;  %2241 = vmatpush3.xpose.msk.msra.mxu1 %vm199_vm1, %v721_v41 }
 0x1ea   :  { %2244 = vmatprep.mubr.msk.f32.mxu1 %vm199_vm1, %v2583_v26  ;;  %v719_v42 = vpop.permute.xlu1 %718  ;;  %v808_v43 = vpop.permute.xlu0 %807 }
 0x1eb   :  { %2242 = vmatprep.subr.msk.mxu1 %vm199_vm1, %v719_v42  ;;  %2247 = vmatprep.subr.msk.mxu0 %vm199_vm1, %v808_v43 }
 0x1ec   :  { %2238 = vmatmul.mubr.msk.f32.vlgmr.msra.gmra.mxu0 %vm199_vm1, %v2574_v23 }
 0x1ed   :  { %2243 = vmatpush3.xpose.msk.msra.mxu1 %vm199_vm1, %v719_v42  ;;  %2248 = vmatpush3.xpose.msk.msra.mxu0 %vm199_vm1, %v808_v43 }
 0x1ee   :  { %2251 = vmatprep.mubr.msk.f32.mxu0 %vm199_vm1, %v2589_v28  ;;  %v806_v44 = vpop.permute.xlu1 %805  ;;  %v1102_v46 = vpop.permute.xlu0 %1101 }
 0x1ef   :  { %2249 = vmatprep.subr.msk.mxu0 %vm199_vm1, %v806_v44 }
 0x1f0   :  { %2245 = vmatmul.mubr.msk.f32.vlgmr.msra.gmra.mxu1 %vm199_vm1, %v2579_v25 }
 0x1f1   :  { %2250 = vmatpush3.xpose.msk.msra.mxu0 %vm199_vm1, %v806_v44 }
 0x1f2   :  { %v1104_v45 = vpop.permute.xlu1 %1103  ;;  %v1278_v18 = vpop.permute.xlu0 %1277 }
 0x1f3   :  { %2254 = vmatprep.subr.mxu1 %v1104_v45 }
 0x1f4   :  { %2252 = vmatmul.mubr.msk.f32.vlgmr.msra.gmra.mxu0 %vm199_vm1, %v2585_v27  ;;  %2255 = vmatpush3.msra.mxu1 %v1104_v45 }
 0x1f5   :  { %2256 = vmatprep.subr.mxu1 %v1102_v46 }
 0x1f6   :  { %v2673_v47 = vpop.permute.xlu1 %1190  ;;  %2257 = vmatpush3.msra.mxu1 %v1102_v46  ;;  %v2738_v22 = vpop.permute.xlu0 %1364 }
 0x1f7   :  { %2261 = vmatprep.subr.mxu1 %v2673_v47 }
 0x1fa   :  { %v2676_v48 = vpop.permute.xlu1 %1188  ;;  %v2740_v23 = vpop.permute.xlu0 %1538 }
 0x1fe   :  { %v2678_v49 = vpop.permute.xlu1 %1275  ;;  %v2742_v24 = vpop.permute.xlu0 %1362 }
 0x202   :  { %v1452_v50 = vpop.permute.xlu1 %1451  ;;  %v2748_v26 = vpop.permute.xlu0 %1536 }
 0x203   :  { %2282 = vmatprep.subr.mxu0 %v1452_v50 }
 0x204   :  { %2283 = vmatpush3.msra.mxu0 %v1452_v50 }
 0x206   :  { %v1450_v51 = vpop.permute.xlu1 %1449 }
 0x207   :  { %2284 = vmatprep.subr.mxu0 %v1450_v51 }
 0x208   :  { %2285 = vmatpush3.msra.mxu0 %v1450_v51 }
 0x20a   :  { %v2680_v52 = vpop.permute.xlu1 %1625 }
 0x20b   :  { %2296 = vmatprep.subr.mxu0 %v2680_v52 }
 0x20e   :  { %v2746_v25 = vpop.permute.xlu1 %1623 }
 0x245   :  { %v2204_v53 = vpop.f32.mrf.mxu1 }
 0x246   :  { %v896_v54 = vsel %vm892_vm2, %v2204_v53, -inf }
 0x247   :  { %897 = vmax.xlane.f32.xlu1 %v896_v54  ;;  %v274_v55 = vpop.f32.mrf.mxu1 }
 0x248   :  { %v893_v56 = vsel %vm892_vm2, %v274_v55, -inf }
 0x249   :  { %v2685_v57 = vpop.f32.mrf.mxu0  ;;  %894 = vmax.xlane.f32.xlu0 %v893_v56 }
 0x24a   :  { %v902_v58 = vsel %vm892_vm2, %v2685_v57, -inf }
 0x24b   :  { %v361_v59 = vpop.f32.mrf.mxu0 }
 0x24c   :  { %v899_v60 = vsel %vm892_vm2, %v361_v59, -inf }
 0x24d   :  { %903 = vmax.xlane.f32.xlu0 %v902_v58 }
 0x251   :  { %900 = vmax.xlane.f32.xlu0 %v899_v60 }
 0x29f   :  { %v2690_v61 = vpop.f32.mrf.mxu1 }
 0x2a0   :  { %v908_v62 = vsel %vm892_vm2, %v2690_v61, -inf }
 0x2a1   :  { %909 = vmax.xlane.f32.xlu0 %v908_v62  ;;  %v2694_v63 = vpop.f32.mrf.mxu1 }
 0x2a2   :  { %v905_v0 = vsel %vm892_vm2, %v2694_v63, -inf }
 0x2a3   :  { %v2698_v1 = vpop.f32.mrf.mxu0  ;;  %906 = vmax.xlane.f32.xlu1 %v905_v0 }
 0x2a4   :  { %v914_v2 = vsel %vm892_vm2, %v2698_v1, -inf }
 0x2a5   :  { %v2702_v3 = vpop.f32.mrf.mxu0 }
 0x2a6   :  { %v911_v7 = vsel %vm892_vm2, %v2702_v3, -inf }
 0x2a7   :  { %915 = vmax.xlane.f32.xlu1 %v914_v2 }
 0x2a8   :  { %v2704_v4 = vpop.f32.mrf.mxu1 }
 0x2a9   :  { %v920_v5 = vsel %vm892_vm2, %v2704_v4, -inf }
 0x2aa   :  { %921 = vmax.xlane.f32.xlu0 %v920_v5  ;;  %v2708_v6 = vpop.f32.mrf.mxu1 }
 0x2ab   :  { %912 = vmax.xlane.f32.xlu1 %v911_v7  ;;  %v917_v9 = vsel %vm892_vm2, %v2708_v6, -inf }
 0x2ac   :  { %v2712_v8 = vpop.f32.mrf.mxu0 }
 0x2ad   :  { %v926_v10 = vsel %vm892_vm2, %v2712_v8, -inf }
 0x2ae   :  { %918 = vmax.xlane.f32.xlu0 %v917_v9  ;;  %v2718_v11 = vpop.f32.mrf.mxu0 }
 0x2af   :  { %927 = vmax.xlane.f32.xlu1 %v926_v10  ;;  %v923_v15 = vsel %vm892_vm2, %v2718_v11, -inf }
 0x2b0   :  { %v2720_v12 = vpop.f32.mrf.mxu1 }
 0x2b1   :  { %v932_v13 = vsel %vm892_vm2, %v2720_v12, -inf }
 0x2b2   :  { %933 = vmax.xlane.f32.xlu0 %v932_v13  ;;  %v2724_v14 = vpop.f32.mrf.mxu1 }
 0x2b3   :  { %924 = vmax.xlane.f32.xlu1 %v923_v15  ;;  %v929_v17 = vsel %vm892_vm2, %v2724_v14, -inf }
 0x2b4   :  { %v2728_v16 = vpop.f32.mrf.mxu0 }
 0x2b5   :  { %v938_v21 = vsel %vm892_vm2, %v2728_v16, -inf }
 0x2b6   :  { %v2732_v19 = vpop.f32.mrf.mxu0  ;;  %930 = vmax.xlane.f32.xlu0 %v929_v17 }
 0x2b7   :  { %v935_v20 = vsel %vm892_vm2, %v2732_v19, -inf }
 0x2b8   :  { %936 = vmax.xlane.f32.xlu1 %v935_v20 }
 0x2ba   :  { %939 = vmax.xlane.f32.xlu0 %v938_v21 }
 0x2c9   :  { %1710 = vrot.lane.b32.xlu1 %v2589_v28, %s2498_s30 }
 0x2d0   :  { %v898_v29 = vpop.xlane.xlu1 %897  ;;  %1712 = vrot.lane.b32.xlu0 %v2585_v27, %s2498_s30 }
 0x2d1   :  { %v942_v30 = vsub.f32 %v2204_v53, %v898_v29 }
 0x2d2   :  { %v895_v31 = vpop.xlane.xlu0 %894 }
 0x2d3   :  { %v941_v32 = vsub.f32 %v274_v55, %v895_v31  ;;  %v959_v33 = vmul.f32 1.442695, %v942_v30 }
 0x2d5   :  { %v957_v34 = vmul.f32 1.442695, %v941_v32 }
 0x2d6   :  { %v904_v35 = vpop.xlane.xlu0 %903 }
 0x2d7   :  { %2333 = vpow2.f32 %v957_v34  ;;  %v944_v36 = vsub.f32 %v2685_v57, %v904_v35 }
 0x2d8   :  { %2335 = vpow2.f32 %v959_v33 }
 0x2d9   :  { %v963_v38 = vmul.f32 1.442695, %v944_v36 }
 0x2da   :  { %v901_v37 = vpop.xlane.xlu0 %900 }
 0x2db   :  { %v943_v28 = vsub.f32 %v361_v59, %v901_v37 }
 0x2dd   :  { %v961_v39 = vmul.f32 1.442695, %v943_v28 }
 0x2df   :  { %2337 = vpow2.f32 %v961_v39 }
 0x2e0   :  { %2339 = vpow2.f32 %v963_v38 }
 0x2e4   :  { %v2753_v40 = vpop.eup %2333 }
 0x2e5   :  { %v2755_v41 = vpop.eup %2335  ;;  %2258 = vmatprep.mubr.msk.f32.mxu1 %vm892_vm2, %v2753_v40 }
 0x2e6   :  { %2259 = vmatmul.mubr.msk.f32.vlgmr.msra.gmra.mxu1 %vm892_vm2, %v2755_v41 }
 0x2e7   :  { %2262 = vmatpush3.msra.mxu1 %v2673_v47 }
 0x2e8   :  { %2263 = vmatprep.subr.mxu1 %v2676_v48 }
 0x2e9   :  { %2264 = vmatpush3.msra.mxu1 %v2676_v48 }
 0x2ea   :  { %2268 = vmatprep.subr.mxu1 %v1278_v18 }
 0x2ec   :  { %v2764_v27 = vpop.eup %2337 }
 0x2ed   :  { %v2766_v42 = vpop.eup %2339  ;;  %2265 = vmatprep.mubr.msk.f32.mxu1 %vm892_vm2, %v2764_v27 }
 0x2ee   :  { %2266 = vmatmul.mubr.msk.f32.vlgmr.msra.gmra.mxu1 %vm892_vm2, %v2766_v42 }
 0x2ef   :  { %2269 = vmatpush3.msra.mxu1 %v1278_v18 }
 0x2f0   :  { %2270 = vmatprep.subr.mxu1 %v2678_v49 }
 0x2f1   :  { %2271 = vmatpush3.msra.mxu1 %v2678_v49 }
 0x2f2   :  { %2275 = vmatprep.subr.mxu1 %v2738_v22 }
 0x32a   :  { %v910_v43 = vpop.xlane.xlu0 %909 }
 0x32b   :  { %v946_v44 = vsub.f32 %v2690_v61, %v910_v43 }
 0x32c   :  { %v907_v45 = vpop.xlane.xlu1 %906 }
 0x32d   :  { %v967_v46 = vmul.f32 1.442695, %v946_v44  ;;  %v945_v47 = vsub.f32 %v2694_v63, %v907_v45  ;;  %v989_v45 = vsel %vm892_vm2, %v2753_v40, 0.0 }
 0x32f   :  { %2341 = vpow2.f32 %v967_v46  ;;  %v965_v48 = vmul.f32 1.442695, %v945_v47  ;;  %v992_v46 = vsel %vm892_vm2, %v2755_v41, 0.0  ;;  %v995_v47 = vsel %vm892_vm2, %v2764_v27, 0.0 }
 0x330   :  { %v916_v50 = vpop.xlane.xlu1 %915 }
 0x331   :  { %2343 = vpow2.f32 %v965_v48  ;;  %v948_v51 = vsub.f32 %v2698_v1, %v916_v50  ;;  %v998_v48 = vsel %vm892_vm2, %v2766_v42, 0.0 }
 0x333   :  { %v971_v53 = vmul.f32 1.442695, %v948_v51  ;;  %v922_v54 = vpop.xlane.xlu0 %921 }
 0x334   :  { %v950_v55 = vsub.f32 %v2704_v4, %v922_v54  ;;  %v913_v49 = vpop.xlane.xlu1 %912 }
 0x335   :  { %2345 = vpow2.f32 %v971_v53  ;;  %v947_v56 = vsub.f32 %v2702_v3, %v913_v49 }
 0x336   :  { %v975_v57 = vmul.f32 1.442695, %v950_v55 }
 0x337   :  { %v969_v58 = vmul.f32 1.442695, %v947_v56  ;;  %v919_v59 = vpop.xlane.xlu0 %918 }
 0x338   :  { %2347 = vpow2.f32 %v975_v57  ;;  %v949_v60 = vsub.f32 %v2708_v6, %v919_v59  ;;  %v928_v61 = vpop.xlane.xlu1 %927 }
 0x339   :  { %2349 = vpow2.f32 %v969_v58  ;;  %v952_v62 = vsub.f32 %v2712_v8, %v928_v61 }
 0x33a   :  { %v973_v63 = vmul.f32 1.442695, %v949_v60 }
 0x33b   :  { %v934_v0 = vpop.xlane.xlu0 %933  ;;  %v979_v2 = vmul.f32 1.442695, %v952_v62 }
 0x33c   :  { %v2342_v1 = vpop.eup %2341  ;;  %2351 = vpow2.f32 %v973_v63  ;;  %v954_v4 = vsub.f32 %v2720_v12, %v934_v0  ;;  %v925_v5 = vpop.xlane.xlu1 %924 }
 0x33d   :  { %v951_v3 = vsub.f32 %v2718_v11, %v925_v5  ;;  %v1004_v7 = vsel %vm892_vm2, %v2342_v1, 0.0  ;;  %2353 = vpow2.f32 %v979_v2 }
 0x33e   :  { %v2344_v9 = vpop.eup %2343  ;;  %1005 = vadd.xlane.f32.xlu1 %v1004_v7  ;;  %v983_v10 = vmul.f32 1.442695, %v954_v4 }
 0x33f   :  { %v977_v6 = vmul.f32 1.442695, %v951_v3  ;;  %v931_v13 = vpop.xlane.xlu0 %930  ;;  %2272 = vmatprep.mubr.msk.f32.mxu1 %vm892_vm2, %v2344_v9  ;;  %v1001_v8 = vsel %vm892_vm2, %v2344_v9, 0.0 }
 0x340   :  { %v953_v15 = vsub.f32 %v2724_v14, %v931_v13  ;;  %2273 = vmatmul.mubr.msk.f32.vlgmr.msra.gmra.mxu1 %vm892_vm2, %v2342_v1  ;;  %1002 = vadd.xlane.f32.xlu0 %v1001_v8 }
 0x341   :  { %2355 = vpow2.f32 %v977_v6  ;;  %2276 = vmatpush3.msra.mxu1 %v2738_v22  ;;  %v937_v11 = vpop.xlane.xlu1 %936 }
 0x342   :  { %v2346_v12 = vpop.eup %2345  ;;  %v981_v17 = vmul.f32 1.442695, %v953_v15  ;;  %v955_v18 = vsub.f32 %v2732_v19, %v937_v11  ;;  %2277 = vmatprep.subr.mxu1 %v2742_v24  ;;  %2357 = vpow2.f32 %v983_v10 }
 0x343   :  { %2278 = vmatpush3.msra.mxu1 %v2742_v24  ;;  %v940_v20 = vpop.xlane.xlu0 %939  ;;  %v1010_v21 = vsel %vm892_vm2, %v2346_v12, 0.0 }
 0x344   :  { %2359 = vpow2.f32 %v981_v17  ;;  %v985_v14 = vmul.f32 1.442695, %v955_v18  ;;  %v956_v29 = vsub.f32 %v2728_v16, %v940_v20  ;;  %2289 = vmatprep.subr.mxu1 %v2740_v23  ;;  %1011 = vadd.xlane.f32.xlu0 %v1010_v21 }
 0x345   :  { %v2348_v22 = vpop.eup %2347  ;;  %v1711_v37 = vpop.permute.xlu1 %1710 }
 0x346   :  { %v2350_v30 = vpop.eup %2349  ;;  %2361 = vpow2.f32 %v985_v14  ;;  %v987_v31 = vmul.f32 1.442695, %v956_v29  ;;  %v1016_v24 = vsel %vm892_vm2, %v2348_v22, 0.0 }
 0x347   :  { %2279 = vmatprep.mubr.msk.f32.mxu1 %vm892_vm2, %v2350_v30  ;;  %v1007_v19 = vsel %vm892_vm2, %v2350_v30, 0.0  ;;  %v1713_v16 = vpop.permute.xlu0 %1712 }
 0x348   :  { %2363 = vpow2.f32 %v987_v31  ;;  %2280 = vmatmul.mubr.msk.f32.vlgmr.msra.gmra.mxu1 %vm892_vm2, %v2346_v12  ;;  %1008 = vadd.xlane.f32.xlu1 %v1007_v19 }
 0x349   :  { %v2352_v32 = vpop.eup %2351  ;;  %2290 = vmatpush3.msra.mxu1 %v2740_v23  ;;  %1017 = vadd.xlane.f32.xlu0 %v1016_v24 }
 0x34a   :  { %2286 = vmatprep.mubr.msk.f32.mxu0 %vm892_vm2, %v2352_v32  ;;  %2291 = vmatprep.subr.mxu1 %v2748_v26  ;;  %v1013_v33 = vsel %vm892_vm2, %v2352_v32, 0.0  ;;  %v2354_v34 = vpop.eup %2353 }
 0x34b   :  { %2287 = vmatmul.mubr.msk.f32.vlgmr.msra.gmra.mxu0 %vm892_vm2, %v2348_v22  ;;  %2292 = vmatpush3.msra.mxu1 %v2748_v26 }
 0x34c   :  { %2297 = vmatpush3.msra.mxu0 %v2680_v52  ;;  %2303 = vmatprep.subr.mxu1 %v1713_v16  ;;  %v1022_v52 = vsel %vm892_vm2, %v2354_v34, 0.0 }
 0x34d   :  { %2298 = vmatprep.subr.mxu0 %v2746_v25  ;;  %1014 = vadd.xlane.f32.xlu0 %v1013_v33 }
 0x34e   :  { %v2356_v23 = vpop.eup %2355  ;;  %2299 = vmatpush3.msra.mxu0 %v2746_v25 }
 0x34f   :  { %2293 = vmatprep.mubr.msk.f32.mxu1 %vm892_vm2, %v2356_v23  ;;  %v1019_v35 = vsel %vm892_vm2, %v2356_v23, 0.0  ;;  %v2358_v36 = vpop.eup %2357  ;;  %v1876_v23 = vld [vmem:[#allocation7 + $0x8] sm:$0xff] }
 0x350   :  { %2294 = vmatmul.mubr.msk.f32.vlgmr.msra.gmra.mxu1 %vm892_vm2, %v2354_v34  ;;  %1020 = vadd.xlane.f32.xlu1 %v1019_v35  ;;  %v1028_v38 = vsel %vm892_vm2, %v2358_v36, 0.0 }
 0x351   :  { %v2360_v26 = vpop.eup %2359  ;;  %1023 = vadd.xlane.f32.xlu0 %v1022_v52  ;;  %2304 = vmatpush3.msra.mxu1 %v1713_v16 }
 0x352   :  { %2300 = vmatprep.mubr.msk.f32.mxu0 %vm892_vm2, %v2360_v26  ;;  %2305 = vmatprep.subr.mxu1 %v1711_v37  ;;  %v1025_v25 = vsel %vm892_vm2, %v2360_v26, 0.0 }
 0x353   :  { %v2362_v28 = vpop.eup %2361  ;;  %2301 = vmatmul.mubr.msk.f32.vlgmr.msra.gmra.mxu0 %vm892_vm2, %v2358_v36  ;;  %2306 = vmatpush3.msra.mxu1 %v1711_v37 }
 0x354   :  { %2307 = vmatprep.mubr.msk.f32.mxu1 %vm892_vm2, %v2362_v28  ;;  %1026 = vadd.xlane.f32.xlu1 %v1025_v25  ;;  %v1031_v43 = vsel %vm892_vm2, %v2362_v28, 0.0  ;;  %v1875_v25 = vld [vmem:[#allocation7] sm:$0xff] }
 0x355   :  { %v2364_v39 = vpop.eup %2363  ;;  %1029 = vadd.xlane.f32.xlu0 %v1028_v38  ;;  %2310 = vmatprep.subr.mxu0 %v1876_v23 }
 0x356   :  { %2308 = vmatmul.mubr.msk.f32.vlgmr.msra.gmra.mxu1 %vm892_vm2, %v2364_v39  ;;  %v1034_v44 = vsel %vm892_vm2, %v2364_v39, 0.0  ;;  %2311 = vmatpush3.msra.mxu0 %v1876_v23 }
 0x357   :  { %2312 = vmatprep.subr.mxu0 %v1875_v25 }
 0x358   :  { %1032 = vadd.xlane.f32.xlu1 %v1031_v43  ;;  %2313 = vmatpush3.msra.mxu0 %v1875_v25 }
 0x359   :  { %1035 = vadd.xlane.f32.xlu0 %v1034_v44 }
 0x35c   :  { %990 = vadd.xlane.f32.xlu1 %v989_v45 }
 0x35d   :  { %993 = vadd.xlane.f32.xlu0 %v992_v46 }
 0x360   :  { %996 = vadd.xlane.f32.xlu1 %v995_v47 }
 0x361   :  { %999 = vadd.xlane.f32.xlu0 %v998_v48 }
 0x3a6   :  { %v2829_v56 = vpop.f32.mrf.mxu1 }
 0x3a8   :  { %v2831_v42 = vpop.f32.mrf.mxu1 }
 0x3ae   :  { %v2833_v61 = vpop.f32.mrf.mxu1 }
 0x3b0   :  { %v2835_v4 = vpop.f32.mrf.mxu1 }
 0x3c7   :  { %v1006_v53 = vpop.xlane.xlu1 %1005 }
 0x3c8   :  { %2365 = vrcp.f32 %v1006_v53 }
 0x3c9   :  { %v1003_v50 = vpop.xlane.xlu0 %1002 }
 0x3ca   :  { %2367 = vrcp.f32 %v1003_v50 }
 0x3cd   :  { %v1012_v51 = vpop.xlane.xlu0 %1011 }
 0x3ce   :  { %2369 = vrcp.f32 %v1012_v51 }
 0x3d1   :  { %v1009_v40 = vpop.xlane.xlu1 %1008 }
 0x3d2   :  { %v1018_v54 = vpop.xlane.xlu0 %1017  ;;  %2371 = vrcp.f32 %v1009_v40 }
 0x3d3   :  { %2373 = vrcp.f32 %v1018_v54 }
 0x3d5   :  { %v2366_v49 = vpop.eup %2365 }
 0x3d6   :  { %v1015_v55 = vpop.xlane.xlu0 %1014  ;;  %v1058_v58 = vmul.f32 %v2366_v49, %v1006_v53 }
 0x3d7   :  { %v2368_v57 = vpop.eup %2367  ;;  %2375 = vrcp.f32 %v1015_v55 }
 0x3d8   :  { %v1057_v60 = vmul.f32 %v2368_v57, %v1003_v50  ;;  %v1074_v63 = vsub.f32 2.0, %v1058_v58 }
 0x3d9   :  { %v1021_v41 = vpop.xlane.xlu1 %1020 }
 0x3da   :  { %v1024_v27 = vpop.xlane.xlu0 %1023  ;;  %2377 = vrcp.f32 %v1021_v41  ;;  %v1073_v1 = vsub.f32 2.0, %v1057_v60  ;;  %v1090_v7 = vmul.f32 %v2366_v49, %v1074_v63 }
 0x3db   :  { %2379 = vrcp.f32 %v1024_v27  ;;  %v2370_v0 = vpop.eup %2369 }
 0x3dc   :  { %v1060_v3 = vmul.f32 %v2370_v0, %v1012_v51  ;;  %v1089_v15 = vmul.f32 %v2368_v57, %v1073_v1 }
 0x3dd   :  { %v1027_v59 = vpop.xlane.xlu1 %1026 }
 0x3de   :  { %v1030_v62 = vpop.xlane.xlu0 %1029  ;;  %2381 = vrcp.f32 %v1027_v59  ;;  %v1076_v12 = vsub.f32 2.0, %v1060_v3 }
 0x3df   :  { %v2372_v2 = vpop.eup %2371  ;;  %2383 = vrcp.f32 %v1030_v62 }
 0x3e0   :  { %v2374_v9 = vpop.eup %2373  ;;  %v1059_v13 = vmul.f32 %v2372_v2, %v1009_v40  ;;  %v1092_v30 = vmul.f32 %v2370_v0, %v1076_v12 }
 0x3e1   :  { %v1033_v5 = vpop.xlane.xlu1 %1032  ;;  %v1062_v17 = vmul.f32 %v2374_v9, %v1018_v54 }
 0x3e2   :  { %v1036_v10 = vpop.xlane.xlu0 %1035  ;;  %2385 = vrcp.f32 %v1033_v5  ;;  %v1075_v21 = vsub.f32 2.0, %v1059_v13 }
 0x3e3   :  { %2387 = vrcp.f32 %v1036_v10  ;;  %v1078_v29 = vsub.f32 2.0, %v1062_v17 }
 0x3e4   :  { %v2376_v20 = vpop.eup %2375  ;;  %v1091_v16 = vmul.f32 %v2372_v2, %v1075_v21 }
 0x3e5   :  { %v1061_v22 = vmul.f32 %v2376_v20, %v1015_v55  ;;  %v1094_v26 = vmul.f32 %v2374_v9, %v1078_v29 }
 0x3e7   :  { %v2378_v14 = vpop.eup %2377  ;;  %v1077_v35 = vsub.f32 2.0, %v1061_v22 }
 0x3e8   :  { %v2380_v31 = vpop.eup %2379  ;;  %v1063_v24 = vmul.f32 %v2378_v14, %v1021_v41 }
 0x3e9   :  { %v1064_v36 = vmul.f32 %v2380_v31, %v1024_v27  ;;  %v1093_v48 = vmul.f32 %v2376_v20, %v1077_v35 }
 0x3ea   :  { %v1079_v38 = vsub.f32 2.0, %v1063_v24 }
 0x3eb   :  { %v2382_v33 = vpop.eup %2381  ;;  %v1080_v46 = vsub.f32 2.0, %v1064_v36 }
 0x3ec   :  { %v2384_v28 = vpop.eup %2383  ;;  %v1065_v39 = vmul.f32 %v2382_v33, %v1027_v59  ;;  %v1095_v55 = vmul.f32 %v2378_v14, %v1079_v38 }
 0x3ed   :  { %v1066_v47 = vmul.f32 %v2384_v28, %v1030_v62  ;;  %v1096_v57 = vmul.f32 %v2380_v31, %v1080_v46 }
 0x3ee   :  { %v1081_v53 = vsub.f32 2.0, %v1065_v39 }
 0x3ef   :  { %v2386_v44 = vpop.eup %2385  ;;  %v1082_v49 = vsub.f32 2.0, %v1066_v47 }
 0x3f0   :  { %v2388_v50 = vpop.eup %2387  ;;  %v1067_v54 = vmul.f32 %v2386_v44, %v1033_v5  ;;  %v1097_v62 = vmul.f32 %v2382_v33, %v1081_v53 }
 0x3f1   :  { %v1068_v27 = vmul.f32 %v2388_v50, %v1036_v10  ;;  %v1098_v3 = vmul.f32 %v2384_v28, %v1082_v49 }
 0x3f2   :  { %v1083_v60 = vsub.f32 2.0, %v1067_v54 }
 0x3f3   :  { %v1084_v2 = vsub.f32 2.0, %v1068_v27 }
 0x3f4   :  { %v1099_v10 = vmul.f32 %v2386_v44, %v1083_v60 }
 0x400   :  { %v2274_v6 = vpop.f32.mrf.mxu1 }
 0x401   :  { %v1802_v8 = vmul.f32 %v2274_v6, %v1090_v7  ;;  %v1100_v6 = vmul.f32 %v2388_v50, %v1084_v2 }
 0x402   :  { %v1353_v11 = vpop.f32.mrf.mxu1 }
 0x403   :  { %v1801_v18 = vmul.f32 %v1353_v11, %v1089_v15  ;;  %1819 = vrot.lane.b32.xlu0 %v1802_v8, %s2499_s4  ;;  %v991_v15 = vpop.xlane.xlu1 %990  ;;  %v994_v11 = vpop.xlane.xlu0 %993 }
 0x404   :  { %2389 = vrcp.f32 %v991_v15 }
 0x405   :  { %1817 = vrot.lane.b32.xlu1 %v1801_v18, %s2499_s4  ;;  %2391 = vrcp.f32 %v994_v11 }
 0x407   :  { %v997_v12 = vpop.xlane.xlu1 %996  ;;  %v1000_v17 = vpop.xlane.xlu0 %999 }
 0x408   :  { %v2281_v19 = vpop.f32.mrf.mxu1  ;;  %2393 = vrcp.f32 %v997_v12 }
 0x409   :  { %v1804_v32 = vmul.f32 %v2281_v19, %v1092_v30  ;;  %2395 = vrcp.f32 %v1000_v17 }
 0x40a   :  { %v1440_v34 = vpop.f32.mrf.mxu1 }
 0x40b   :  { %v1803_v52 = vmul.f32 %v1440_v34, %v1091_v16  ;;  %v2288_v37 = vpop.f32.mrf.mxu0  ;;  %1823 = vrot.lane.b32.xlu1 %v1804_v32, %s2499_s4 }
 0x40c   :  { %v1806_v43 = vmul.f32 %v2288_v37, %v1094_v26 }
 0x40d   :  { %1821 = vrot.lane.b32.xlu0 %v1803_v52, %s2499_s4  ;;  %v1527_v45 = vpop.f32.mrf.mxu0 }
 0x40e   :  { %v1805_v40 = vmul.f32 %v1527_v45, %v1093_v48 }
 0x40f   :  { %1835 = vrot.lane.b32.xlu1 %v1806_v43, %s2492_s18 }
 0x410   :  { %v2295_v51 = vpop.f32.mrf.mxu1 }
 0x411   :  { %v1808_v63 = vmul.f32 %v2295_v51, %v1096_v57  ;;  %v2390_v18 = vpop.eup %2389 }
 0x412   :  { %v1614_v41 = vpop.f32.mrf.mxu1  ;;  %v2392_v21 = vpop.eup %2391  ;;  %v1053_v14 = vmul.f32 %v2390_v18, %v991_v15 }
 0x413   :  { %v1807_v58 = vmul.f32 %v1614_v41, %v1095_v55  ;;  %v2302_v59 = vpop.f32.mrf.mxu0  ;;  %1833 = vrot.lane.b32.xlu1 %v1805_v40, %s2492_s18  ;;  %v1054_v30 = vmul.f32 %v2392_v21, %v994_v11 }
 0x414   :  { %v1810_v9 = vmul.f32 %v2302_v59, %v1098_v3  ;;  %v1069_v24 = vsub.f32 2.0, %v1053_v14  ;;  %v2101_v59 = vld [vmem:[#allocation7 + $0x10] ss:$0 sm:$0xff] }
 0x415   :  { %v1701_v0 = vpop.f32.mrf.mxu0  ;;  %1837 = vrot.lane.b32.xlu0 %v1807_v58, %s2492_s18  ;;  %v2394_v29 = vpop.eup %2393  ;;  %v1070_v33 = vsub.f32 2.0, %v1054_v30 }
 0x416   :  { %v2309_v1 = vpop.f32.mrf.mxu1  ;;  %v1809_v5 = vmul.f32 %v1701_v0, %v1097_v62  ;;  %v2396_v31 = vpop.eup %2395  ;;  %v1055_v32 = vmul.f32 %v2394_v29, %v997_v12  ;;  %v1085_v35 = vmul.f32 %v2390_v18, %v1069_v24 }
 0x417   :  { %1839 = vrot.lane.b32.xlu1 %v1808_v63, %s2492_s18  ;;  %v1812_v8 = vmul.f32 %v2309_v1, %v1100_v6  ;;  %v1056_v34 = vmul.f32 %v2396_v31, %v1000_v17  ;;  %v1086_v26 = vmul.f32 %v2392_v21, %v1070_v33 }
 0x418   :  { %v1788_v7 = vpop.f32.mrf.mxu1  ;;  %v1071_v36 = vsub.f32 2.0, %v1055_v32  ;;  %v1797_v38 = vmul.f32 %v2831_v42, %v1085_v35 }
 0x419   :  { %1849 = vrot.lane.b32.xlu0 %v1809_v5, %s2500_s5  ;;  %v1811_v13 = vmul.f32 %v1788_v7, %v1099_v10  ;;  %v1072_v37 = vsub.f32 2.0, %v1056_v34  ;;  %v1798_v44 = vmul.f32 %v2829_v56, %v1086_v26 }
 0x41a   :  { %v1087_v25 = vmul.f32 %v2394_v29, %v1071_v36 }
 0x41b   :  { %1851 = vrot.lane.b32.xlu1 %v1810_v9, %s2500_s5  ;;  %v1088_v43 = vmul.f32 %v2396_v31, %v1072_v37 }
 0x41c   :  { %v1799_v50 = vmul.f32 %v2835_v4, %v1087_v25 }
 0x41d   :  { %1853 = vrot.lane.b32.xlu0 %v1811_v13, %s2500_s5  ;;  %v1800_v54 = vmul.f32 %v2833_v61, %v1088_v43 }
 0x41f   :  { %1855 = vrot.lane.b32.xlu1 %v1812_v8, %s2500_s5 }
 0x475   :  { %v1820_v19 = vpop.permute.xlu0 %1819 }
 0x476   :  { %v1862_v48 = vsel %vm199_vm1, %v1798_v44, %v1820_v19 }
 0x477   :  { %v1818_v20 = vpop.permute.xlu1 %1817 }
 0x478   :  { %v1861_v45 = vsel %vm199_vm1, %v1797_v38, %v1818_v20 }
 0x47d   :  { %v1824_v22 = vpop.permute.xlu1 %1823 }
 0x47e   :  { %v1864_v4 = vsel %vm199_vm1, %v1800_v54, %v1824_v22 }
 0x47f   :  { %v1822_v23 = vpop.permute.xlu0 %1821 }
 0x480   :  { %v1863_v56 = vsel %vm199_vm1, %v1799_v50, %v1822_v23 }
 0x481   :  { %v1836_v16 = vpop.permute.xlu1 %1835 }
 0x482   :  { %v1867_v53 = vsel %vm1865_vm4, %v1862_v48, %v1836_v16 }
 0x485   :  { %v1834_v52 = vpop.permute.xlu1 %1833 }
 0x486   :  { %v1866_v46 = vsel %vm1865_vm4, %v1861_v45, %v1834_v52 }
 0x487   :  { %v1838_v28 = vpop.permute.xlu0 %1837 }
 0x488   :  { %v1868_v55 = vsel %vm1865_vm4, %v1863_v56, %v1838_v28  ;;  %v2401_v56 = vld [vmem:[#allocation2 + $0x8] sm:$0xff] }
 0x489   :  { %v1840_v39 = vpop.permute.xlu1 %1839 }
 0x48a   :  { %v1869_v27 = vsel %vm1865_vm4, %v1864_v4, %v1840_v39 }
 0x48b   :  { %v1850_v47 = vpop.permute.xlu0 %1849 }
 0x48c   :  { %v1871_v51 = vsel %vm1870_vm3, %v1866_v46, %v1850_v47 }
 0x48d   :  { %v1852_v42 = vpop.permute.xlu1 %1851  ;;  %2314 = vmatprep.mubr.msk.f32.mxu0 %vm892_vm2, %v1871_v51  ;;  %v2399_v51 = vld [vmem:[#allocation2 + $0x10] sm:$0xff] }
 0x48e   :  { %v1872_v40 = vsel %vm1870_vm3, %v1867_v53, %v1852_v42  ;;  %v2400_v42 = vld [vmem:[#allocation2] sm:$0xff] }
 0x48f   :  { %2315 = vmatmul.mubr.msk.f32.vlgmr.msra.gmra.mxu0 %vm892_vm2, %v1872_v40  ;;  %v1854_v41 = vpop.permute.xlu0 %1853 }
 0x490   :  { %v1873_v49 = vsel %vm1870_vm3, %v1868_v55, %v1854_v41  ;;  %v2402_v55 = vld [vmem:[#allocation2 + $0x18] sm:$0xff] }
 0x491   :  { %v1856_v57 = vpop.permute.xlu1 %1855  ;;  %2317 = vmatprep.mubr.msk.f32.mxu0 %vm892_vm2, %v1873_v49 }
 0x492   :  { %v1874_v61 = vsel %vm1870_vm3, %v1869_v27, %v1856_v57 }
 0x493   :  { %2318 = vmatmul.mubr.msk.f32.gmra.mxu0 %vm892_vm2, %v1874_v61 }
 0x54f   :  { %v2316_v58 = vpop.f32.mrf.mxu0 }
 0x550   :  { %v1966_v63 = vadd.f32 %v2316_v58, %v2101_v59 }
 0x551   :  { %v1960_v60 = vpop.f32.mrf.mxu0 }
 0x552   :  { %v1961_v62 = vadd.f32 %v2101_v59, %v1960_v60  ;;  %v1980_v3 = vsel %vm69_vm0, %v1966_v63, 0.0 }
 0x553   :  { %v2319_v0 = vpop.f32.mrf.mxu0 }
 0x554   :  { %v1979_v1 = vsel %vm69_vm0, %v1961_v62, 0.0  ;;  %v1976_v5 = vadd.f32 %v2319_v0, %v2101_v59 }
 0x555   :  { %v1970_v2 = vpop.f32.mrf.mxu0  ;;  %v1981_v9 = vadd.f32 %v1980_v3, %v1979_v1 }
 0x556   :  { %v1971_v7 = vadd.f32 %v2101_v59, %v1970_v2  ;;  %v1984_v13 = vsel %vm69_vm0, %v1976_v5, 0.0 }
 0x558   :  { %v1982_v10 = vsel %vm69_vm0, %v1971_v7, 0.0 }
 0x559   :  { %v1983_v6 = vadd.f32 %v1982_v10, %v1981_v9 }
 0x55b   :  { %v1985_v8 = vadd.f32 %v1984_v13, %v1983_v6 }
 0x55d   :  { %v1986_v15 = vrot.slane %v1985_v8, 4 }
 0x55f   :  { %v1987_v11 = vadd.f32 %v1986_v15, %v1985_v8 }
 0x561   :  { %v1988_v12 = vrot.slane %v1987_v11, 2 }
 0x563   :  { %v1989_v17 = vadd.f32 %v1988_v12, %v1987_v11 }
 0x565   :  { %v1990_v18 = vrot.slane %v1989_v17, 1 }
 0x567   :  { %v1991_v20 = vadd.f32 %v1990_v18, %v1989_v17 }
 0x569   :  { %v1993_v21 = vmul.f32 0.03125, %v1991_v20 }
 0x56b   :  { %v1994_v14 = vsub.f32 %v1961_v62, %v1993_v21  ;;  %v1995_v29 = vsub.f32 %v1966_v63, %v1993_v21  ;;  %v1996_v22 = vsub.f32 %v1971_v7, %v1993_v21  ;;  %v1997_v30 = vsub.f32 %v1976_v5, %v1993_v21 }
 0x56d   :  { %v1998_v31 = vmul.f32 %v1994_v14, %v1994_v14  ;;  %v1999_v19 = vmul.f32 %v1995_v29, %v1995_v29  ;;  %v2000_v24 = vmul.f32 %v1996_v22, %v1996_v22  ;;  %v2001_v32 = vmul.f32 %v1997_v30, %v1997_v30 }
 0x56f   :  { %v2002_v16 = vsel %vm69_vm0, %v1998_v31, 0.0  ;;  %v2003_v33 = vsel %vm69_vm0, %v1999_v19, 0.0  ;;  %v2005_v23 = vsel %vm69_vm0, %v2000_v24, 0.0  ;;  %v2007_v36 = vsel %vm69_vm0, %v2001_v32, 0.0 }
 0x570   :  { %v2004_v34 = vadd.f32 %v2003_v33, %v2002_v16 }
 0x572   :  { %v2006_v35 = vadd.f32 %v2005_v23, %v2004_v34 }
 0x574   :  { %v2008_v52 = vadd.f32 %v2007_v36, %v2006_v35 }
 0x576   :  { %v2009_v26 = vrot.slane %v2008_v52, 4 }
 0x578   :  { %v2010_v37 = vadd.f32 %v2009_v26, %v2008_v52 }
 0x57a   :  { %v2011_v28 = vrot.slane %v2010_v37, 2 }
 0x57c   :  { %v2012_v25 = vadd.f32 %v2011_v28, %v2010_v37 }
 0x57e   :  { %v2013_v38 = vrot.slane %v2012_v25, 1 }
 0x580   :  { %v2014_v39 = vadd.f32 %v2013_v38, %v2012_v25 }
 0x582   :  { %v2015_v43 = vmul.f32 0.03125, %v2014_v39 }
 0x584   :  { %v2016_v44 = vadd.f32 1e-05, %v2015_v43 }
 0x586   :  { %2397 = vrsqrt.f32 %v2016_v44 }
 0x593   :  { %v2398_v45 = vpop.eup %2397 }
 0x594   :  { %v2020_v46 = vmul.f32 %v2398_v45, %v1996_v22  ;;  %v2018_v47 = vmul.f32 %v2398_v45, %v1994_v14  ;;  %v2019_v48 = vmul.f32 %v2398_v45, %v1995_v29  ;;  %v2021_v50 = vmul.f32 %v2398_v45, %v1997_v30 }
 0x596   :  { %v2024_v53 = vadd.f32 %v2399_v51, %v2020_v46  ;;  %v2022_v54 = vadd.f32 %v2400_v42, %v2018_v47  ;;  %v2023_v40 = vadd.f32 %v2401_v56, %v2019_v48  ;;  %v2025_v41 = vadd.f32 %v2402_v55, %v2021_v50 }
 0x598   :  { %2028 = vst.msk [vmem:[#allocation8 + $0x10] sm:$0xff] %vm69_vm0, %v2024_v53  ;;  %2026 = vst.msk [vmem:[#allocation8] sm:$0xff] %vm69_vm0, %v2022_v54 }
 0x599   :  { %2027 = vst.msk [vmem:[#allocation8 + $0x8] sm:$0xff] %vm69_vm0, %v2023_v40  ;;  %2029 = vst.msk [vmem:[#allocation8 + $0x18] sm:$0xff] %vm69_vm0, %v2025_v41 }
 0x59a   :  { %2474 = shalt.err (!%p2471_p5)
}
 0x59b   :  { %2041 = dma.vmem_to_hbm [thread:$0]  %s2036_s7, 512, %s2882_s3, [#allocation4], %s2491_s17, %s2491_s17, %s2492_s18  }
 0x59c   :  { %2487 = dma.done.wait [#allocation4], 512  }
 0x59d   :  { %2488 = vsyncadd [#allocation4], 4294966784 }
 0x59e   :  { %2045 = vsyncpa [#allocation3], 1 }
 0x59f   :  { %2046 = vsyncpa [#allocation6], 1 }
 0x5a0   :  { %2047 = vsyncpa [#allocation4], 1 }

</bundles_post_ra>
